<compile_context>
chip_gen: v7x
topology: tpu7x:2x2x1
jax: 0.10.0
libtpu: 0.0.40
codegen_flags: <defaults>
</compile_context>

<pallas_src>
import functools

import jax
import jax.numpy as jnp
from jax import lax
from jax.experimental import pallas as pl
from jax.experimental.pallas import tpu as pltpu

HIDDEN_DIM = 32
WIDTH = 64


def _round_up(x, m):
    return ((x + m - 1) // m) * m


# ----------------------------- Pallas kernels ------------------------------

def _hypernet_kernel(t_ref, w1_ref, b1_ref, w2_ref, b2_ref, w3_ref, b3_ref,
                     out_ref, *, blocksize, width):
    """HyperNetwork.forward(t): MLP + sigmoid gating, ONE merged lane-dense output.

    Output layout (lanes): [0:bs] = W, [bs:2bs] = U * sigmoid(G), [2bs:2bs+width] = B.
    """
    t = t_ref[0]                                                  # scalar from SMEM
    # fc1 has in_dim == 1 -> scalar broadcast off the scalar path (no MXU needed).
    h1 = jnp.tanh(t * w1_ref[...] + b1_ref[...])                  # (1, hidden)
    h2 = jnp.tanh(jnp.dot(h1, w2_ref[...],
                          preferred_element_type=jnp.float32) + b2_ref[...])
    p = jnp.dot(h2, w3_ref[...],
                preferred_element_type=jnp.float32) + b3_ref[...]  # (1, 3*bs+width)
    out_ref[...] = jnp.zeros_like(out_ref)
    out_ref[:, :blocksize] = p[:, :blocksize]                      # W
    out_ref[:, blocksize:2 * blocksize] = (
        p[:, blocksize:2 * blocksize]
        * jax.nn.sigmoid(p[:, 2 * blocksize:3 * blocksize]))       # U gated
    out_ref[:, 2 * blocksize:2 * blocksize + width] = (
        p[:, 3 * blocksize:3 * blocksize + width])                 # B


def _cnf_dynamics(p, z_cols, *, in_out_dim, width, width_p):
    """Closed-form CNF dynamics from one (1, Np) hyper-net params row.

      dz_dt[b,d] = (1/width) * sum_w tanh(z[b,:].W[w,:] + B[w]) * U[w,d]
      dlogp[b]   = -(1/width) * sum_w (1 - h[b,w]^2) * sum_d W[w,d]*U[w,d]

    The params row has been re-laid-out so each logical width-vector (W_d, U_d, G_d, B)
    occupies its own 128-lane-aligned, zero-padded block; pad lanes contribute 0.
    """
    D = in_out_dim
    b_row = p[:, 3 * D * width_p:(3 * D + 1) * width_p]            # (1, width_p) = B
    s = b_row                                                      # -> (batch, width_p)
    wu = jnp.zeros((1, width_p), jnp.float32)                      # sum_d W[w,d]*U[w,d]
    u_rows = []
    for d in range(D):                                             # static, tiny D
        w_row = p[:, d * width_p:(d + 1) * width_p]
        u_row = (p[:, (D + d) * width_p:(D + d + 1) * width_p]
                 * jax.nn.sigmoid(p[:, (2 * D + d) * width_p:(2 * D + d + 1) * width_p]))
        u_rows.append(u_row)
        s = s + z_cols[d] * w_row
        wu = wu + w_row * u_row
    h = jnp.tanh(s)                                                # (batch, width_p)
    a = 1.0 - h * h
    inv_w = 1.0 / float(width)
    dz_cols = [jnp.sum(h * u_rows[d], axis=1, keepdims=True) * inv_w for d in range(D)]
    dlp = jnp.sum(a * wu, axis=1, keepdims=True) * (-inv_w)
    return dz_cols, dlp


def _cnf_fused_kernel(t_ref, w1_ref, b1_ref, w2_ref, b2_ref, w3c_ref, b3c_ref, z_ref,
                      out_ref, *, in_out_dim, width, width_p):
    """Single fused hyper-net + CNF dynamics evaluation."""
    t = t_ref[0]                                                   # scalar from SMEM
    h1 = jnp.tanh(t * w1_ref[...] + b1_ref[...])
    h2 = jnp.tanh(jnp.dot(h1, w2_ref[...],
                          preferred_element_type=jnp.float32) + b2_ref[...])
    p = jnp.dot(h2, w3c_ref[...],
                preferred_element_type=jnp.float32) + b3c_ref[...]  # (1, Np)
    z_cols = [z_ref[:, d:d + 1] for d in range(in_out_dim)]
    dz_cols, dlp = _cnf_dynamics(p, z_cols, in_out_dim=in_out_dim,
                                 width=width, width_p=width_p)
    out_ref[...] = jnp.zeros_like(out_ref)
    for d in range(in_out_dim):
        out_ref[:, d:d + 1] = dz_cols[d]
    out_ref[:, in_out_dim:in_out_dim + 1] = dlp


def _cnf_euler_kernel(ts_ref, dt_ref, w1_ref, b1_ref, w2_ref, b2_ref, w3c_ref, b3c_ref,
                      z0_ref, lp0_ref, out_ref, p_scr,
                      *, num_steps, in_out_dim, width, width_p):
    """Entire fixed-step Euler CNF integration in one kernel.

    Hyper-net MLP is batched over ALL solver steps (one (S,32)x(32,Np) matmul), cached in
    VMEM scratch; z / logp are carried through an unrolled fori_loop; one output write.
    """
    # --- batched hyper-net for all steps (t grid known up front) ---
    h1 = jnp.tanh(ts_ref[...] * w1_ref[...] + b1_ref[...])         # (S, hidden)
    h2 = jnp.tanh(jnp.dot(h1, w2_ref[...],
                          preferred_element_type=jnp.float32) + b2_ref[...])
    p_scr[...] = jnp.dot(h2, w3c_ref[...],
                         preferred_element_type=jnp.float32) + b3c_ref[...]  # (S, Np)

    dt = dt_ref[0]                                                 # scalar from SMEM

    def body(i, carry):
        z_cols, lp = carry
        p = p_scr[pl.ds(i, 1), :]                                  # (1, Np)
        dz_cols, dlp = _cnf_dynamics(p, z_cols, in_out_dim=in_out_dim,
                                     width=width, width_p=width_p)
        z_cols = tuple(z_cols[d] + dt * dz_cols[d] for d in range(in_out_dim))
        return z_cols, lp + dt * dlp

    z_cols0 = tuple(z0_ref[:, d:d + 1] for d in range(in_out_dim))
    z_cols_f, lp_f = lax.fori_loop(0, num_steps, body, (z_cols0, lp0_ref[...]),
                                   unroll=True)

    out_ref[...] = jnp.zeros_like(out_ref)
    for d in range(in_out_dim):
        out_ref[:, d:d + 1] = z_cols_f[d]
    out_ref[:, in_out_dim:in_out_dim + 1] = lp_f


# ------------------------------- wrappers -----------------------------------

_SMEM = pltpu.MemorySpace.SMEM
_VMEM = pltpu.MemorySpace.VMEM


def hyper_network_forward(t, hn_params, *, in_out_dim, width=WIDTH):
    """Pallas equivalent of HyperNetwork.forward(t) -> [W, B, U] (torch shapes)."""
    w1, b1, w2, b2, w3, b3 = hn_params
    bs = width * in_out_dim
    out_n = _round_up(2 * bs + width, 128)
    t1d = jnp.reshape(t, (1,)).astype(jnp.float32)
    merged = pl.pallas_call(
        functools.partial(_hypernet_kernel, blocksize=bs, width=width),
        out_shape=jax.ShapeDtypeStruct((1, out_n), jnp.float32),
        in_specs=[pl.BlockSpec(memory_space=_SMEM)]
                 + [pl.BlockSpec(memory_space=_VMEM)] * 6,
        out_specs=pl.BlockSpec(memory_space=_VMEM),
    )(t1d, w1, b1, w2, b2, w3, b3)
    W = merged[0, :bs].reshape(width, in_out_dim, 1)
    U = merged[0, bs:2 * bs].reshape(width, 1, in_out_dim)   # already gated by sigmoid(G)
    B = merged[0, 2 * bs:2 * bs + width].reshape(width, 1, 1)
    return [W, B, U]


def prepare_cnf_params(hn_params, *, in_out_dim, width=WIDTH):
    """One-time re-layout of the hyper-net fc3 weights for the fused CNF kernels.

    Every logical width-vector (W_d, U_raw_d, G_d, B) gets its own 128-lane-aligned,
    zero-padded column block, so all in-kernel slices are 128-aligned lane views.
    NOTE: pass the RAW hn_params here; pass the returned tuple only to cnf_* wrappers.
    """
    w1, b1, w2, b2, w3, b3 = hn_params
    D = in_out_dim
    bs = width * D
    width_p = _round_up(width, 128)
    hidden = w3.shape[0]

    def split_blocks(mat):
        # mat: (rows, 3*bs + width), original torch column order (w-major within W/U/G).
        rows = mat.shape[0]
        W_src = mat[:, :bs].reshape(rows, width, D)
        U_src = mat[:, bs:2 * bs].reshape(rows, width, D)
        G_src = mat[:, 2 * bs:3 * bs].reshape(rows, width, D)
        B_src = mat[:, 3 * bs:3 * bs + width]
        pad = ((0, 0), (0, width_p - width))
        blocks = [jnp.pad(W_src[:, :, d], pad) for d in range(D)]
        blocks += [jnp.pad(U_src[:, :, d], pad) for d in range(D)]
        blocks += [jnp.pad(G_src[:, :, d], pad) for d in range(D)]
        blocks += [jnp.pad(B_src, pad)]
        return jnp.concatenate(blocks, axis=1)                     # (rows, (3D+1)*width_p)

    return (w1, b1, w2, b2, split_blocks(w3), split_blocks(b3))


def cnf_forward(t, states, prepared_params, *, in_out_dim, width=WIDTH):
    """CNF dynamics f(t, (z, logp)) -> (dz_dt, dlogp_z_dt), one fused pallas_call."""
    z, _logp_z = states                                            # logp unused by dynamics
    batch = z.shape[0]
    w1, b1, w2, b2, w3c, b3c = prepared_params
    width_p = _round_up(width, 128)
    out_n = _round_up(in_out_dim + 1, 128)
    t1d = jnp.reshape(t, (1,)).astype(jnp.float32)
    out = pl.pallas_call(
        functools.partial(_cnf_fused_kernel, in_out_dim=in_out_dim,
                          width=width, width_p=width_p),
        out_shape=jax.ShapeDtypeStruct((batch, out_n), jnp.float32),
        in_specs=[pl.BlockSpec(memory_space=_SMEM)]
                 + [pl.BlockSpec(memory_space=_VMEM)] * 7,
        out_specs=pl.BlockSpec(memory_space=_VMEM),
    )(t1d, w1, b1, w2, b2, w3c, b3c, z)
    return out[:, :in_out_dim], out[:, in_out_dim:in_out_dim + 1]


def cnf_integrate_euler(t0, t1, num_steps, z0, logp0, prepared_params,
                        *, in_out_dim, width=WIDTH):
    """Whole fixed-step Euler CNF integration in ONE pallas_call (the hot path)."""
    batch = z0.shape[0]
    w1, b1, w2, b2, w3c, b3c = prepared_params
    width_p = _round_up(width, 128)
    n_p = (3 * in_out_dim + 1) * width_p
    out_n = _round_up(in_out_dim + 1, 128)

    t0 = jnp.float32(t0)
    t1 = jnp.float32(t1)
    dt = (t1 - t0) / jnp.float32(num_steps)
    ts = (t0 + dt * jnp.arange(num_steps, dtype=jnp.float32)).reshape(num_steps, 1)
    dt1d = jnp.reshape(dt, (1,))

    out = pl.pallas_call(
        functools.partial(_cnf_euler_kernel, num_steps=num_steps,
                          in_out_dim=in_out_dim, width=width, width_p=width_p),
        out_shape=jax.ShapeDtypeStruct((batch, out_n), jnp.float32),
        in_specs=[pl.BlockSpec(memory_space=_VMEM),                # ts (vector operand)
                  pl.BlockSpec(memory_space=_SMEM)]                # dt (scalar)
                 + [pl.BlockSpec(memory_space=_VMEM)] * 8,
        out_specs=pl.BlockSpec(memory_space=_VMEM),
        scratch_shapes=[pltpu.VMEM((num_steps, n_p), jnp.float32)],
    )(ts, dt1d, w1, b1, w2, b2, w3c, b3c, z0, logp0)
    return out[:, :in_out_dim], out[:, in_out_dim:in_out_dim + 1]


# --------------------------- pure-JAX references ------------------------------

def _ref_hypernet(t, hn_params, *, in_out_dim, width=WIDTH):
    w1, b1, w2, b2, w3, b3 = hn_params
    p = jnp.reshape(t, (1, 1)).astype(jnp.float32)
    p = jnp.tanh(p @ w1 + b1)
    p = jnp.tanh(p @ w2 + b2)
    p = (p @ w3 + b3).reshape(-1)
    bs = width * in_out_dim
    W = p[:bs].reshape(width, in_out_dim, 1)
    U = p[bs:2 * bs].reshape(width, 1, in_out_dim)
    G = p[2 * bs:3 * bs].reshape(width, 1, in_out_dim)
    U = U * jax.nn.sigmoid(G)
    B = p[3 * bs:].reshape(width, 1, 1)
    return W, B, U


def _ref_forward(t, z, hn_params, *, in_out_dim, width=WIDTH):
    W, B, U = _ref_hypernet(t, hn_params, in_out_dim=in_out_dim, width=width)

    def f(zz):
        Zz = jnp.broadcast_to(zz[None], (width,) + zz.shape)
        hh = jnp.tanh(jnp.matmul(Zz, W) + B)            # (width, batch, 1)
        return jnp.matmul(hh, U).mean(0)                # (batch, D)

    dz_dt = f(z)
    jac = jax.jacfwd(f)(z)                              # (batch, D, batch, D)
    bidx = jnp.arange(z.shape[0])
    per_sample = jac[bidx, :, bidx, :]                  # (batch, D, D)
    trace = jnp.trace(per_sample, axis1=1, axis2=2)
    return dz_dt, -trace.reshape(-1, 1)


def _ref_integrate_euler(t0, t1, num_steps, z0, logp0, hn_params, *, in_out_dim,
                         width=WIDTH):
    dt = (t1 - t0) / num_steps
    z, lp = z0, logp0
    for i in range(num_steps):
        t = t0 + dt * i
        dz, dlp = _ref_forward(t, z, hn_params, in_out_dim=in_out_dim, width=width)
        z = z + dt * dz
        lp = lp + dt * dlp
    return z, lp


# --------------------------------- main --------------------------------------

if __name__ == "__main__":
    in_out_dim = 2
    batch = 8
    blocksize = WIDTH * in_out_dim
    out_dim = 3 * blocksize + WIDTH                     # 448

    key = jax.random.PRNGKey(0)
    ks = jax.random.split(key, 8)
    w1 = jax.random.normal(ks[0], (1, HIDDEN_DIM), jnp.float32) * 0.5
    b1 = jax.random.normal(ks[1], (1, HIDDEN_DIM), jnp.float32) * 0.1
    w2 = jax.random.normal(ks[2], (HIDDEN_DIM, HIDDEN_DIM), jnp.float32) / jnp.sqrt(HIDDEN_DIM)
    b2 = jax.random.normal(ks[3], (1, HIDDEN_DIM), jnp.float32) * 0.1
    w3 = jax.random.normal(ks[4], (HIDDEN_DIM, out_dim), jnp.float32) / jnp.sqrt(HIDDEN_DIM)
    b3 = jax.random.normal(ks[5], (1, out_dim), jnp.float32) * 0.1
    hn_params = (w1, b1, w2, b2, w3, b3)

    z = jax.random.normal(ks[6], (batch, in_out_dim), jnp.float32)
    logp_z = jnp.zeros((batch, 1), jnp.float32)
    t = jnp.float32(0.5)

    # --- 1) HyperNetwork.forward(t) -> [W, B, U] (the module spec) ---
    W, B, U = hyper_network_forward(t, hn_params, in_out_dim=in_out_dim)
    W, B, U = jax.block_until_ready((W, B, U))
    rW, rB, rU = _ref_hypernet(t, hn_params, in_out_dim=in_out_dim)
    assert W.shape == (WIDTH, in_out_dim, 1)
    assert B.shape == (WIDTH, 1, 1)
    assert U.shape == (WIDTH, 1, in_out_dim)
    assert jnp.allclose(W, rW, atol=5e-3, rtol=5e-3)
    assert jnp.allclose(B, rB, atol=5e-3, rtol=5e-3)
    assert jnp.allclose(U, rU, atol=5e-3, rtol=5e-3)

    # --- 2) single fused CNF dynamics evaluation ---
    prepared = prepare_cnf_params(hn_params, in_out_dim=in_out_dim)   # one-time weight prep
    dz_dt, dlogp = cnf_forward(t, (z, logp_z), prepared, in_out_dim=in_out_dim)
    dz_dt, dlogp = jax.block_until_ready((dz_dt, dlogp))
    ref_dz, ref_dlogp = _ref_forward(t, z, hn_params, in_out_dim=in_out_dim)
    assert dz_dt.shape == (batch, in_out_dim) and dlogp.shape == (batch, 1)
    assert jnp.allclose(dz_dt, ref_dz, atol=2e-3, rtol=2e-3)
    assert jnp.allclose(dlogp, ref_dlogp, atol=2e-3, rtol=2e-3)

    # --- 3) whole fixed-step Euler integration fused into ONE pallas_call ---
    num_steps = 8
    zT, lpT = cnf_integrate_euler(0.0, 0.5, num_steps, z, logp_z, prepared,
                                  in_out_dim=in_out_dim)
    zT, lpT = jax.block_until_ready((zT, lpT))
    ref_zT, ref_lpT = _ref_integrate_euler(0.0, 0.5, num_steps, z, logp_z, hn_params,
                                           in_out_dim=in_out_dim)
    assert zT.shape == (batch, in_out_dim) and lpT.shape == (batch, 1)
    assert jnp.allclose(zT, ref_zT, atol=5e-3, rtol=5e-3)
    assert jnp.allclose(lpT, ref_lpT, atol=5e-3, rtol=5e-3)

    print("KERNEL_OK")
</pallas_src>

<mosaic_0001>
module attributes {stable_mosaic.version = 11 : i64} {
  func.func @_hypernet_kernel(%arg0: memref<1xf32, #tpu.memory_space<smem>>, %arg1: memref<1x32xf32, #tpu.memory_space<vmem>>, %arg2: memref<1x32xf32, #tpu.memory_space<vmem>>, %arg3: memref<32x32xf32, #tpu.memory_space<vmem>>, %arg4: memref<1x32xf32, #tpu.memory_space<vmem>>, %arg5: memref<32x448xf32, #tpu.memory_space<vmem>>, %arg6: memref<1x448xf32, #tpu.memory_space<vmem>>, %arg7: memref<1x384xf32, #tpu.memory_space<vmem>>) attributes {dimension_semantics = [], scalar_prefetch = 0 : i64, scratch_operands = 0 : i64, tpu.core_type = #tpu.core_type<tc>} {
    %c0 = arith.constant 0 : index
    %0 = memref.load %arg0[%c0] : memref<1xf32, #tpu.memory_space<smem>>
    %c0_0 = arith.constant 0 : index
    %c0_1 = arith.constant 0 : index
    %1 = vector.load %arg1[%c0_0, %c0_1] : memref<1x32xf32, #tpu.memory_space<vmem>>, vector<1x32xf32>
    %2 = vector.broadcast %0 : f32 to vector<1x32xf32>
    %3 = arith.mulf %2, %1 : vector<1x32xf32>
    %c0_2 = arith.constant 0 : index
    %c0_3 = arith.constant 0 : index
    %4 = vector.load %arg2[%c0_2, %c0_3] : memref<1x32xf32, #tpu.memory_space<vmem>>, vector<1x32xf32>
    %5 = arith.addf %3, %4 : vector<1x32xf32>
    %6 = math.tanh %5 : vector<1x32xf32>
    %c0_4 = arith.constant 0 : index
    %c0_5 = arith.constant 0 : index
    %7 = vector.load %arg3[%c0_4, %c0_5] : memref<32x32xf32, #tpu.memory_space<vmem>>, vector<32x32xf32>
    %cst = arith.constant dense<0.000000e+00> : vector<1x32xf32>
    %8 = tpu.matmul %6, %7, %cst {dimension_numbers = #tpu.dot_dimension_numbers<[1], [0], [0], [1], [0, 0, 1, 1], [], []>} : vector<1x32xf32>, vector<32x32xf32>, vector<1x32xf32> -> vector<1x32xf32>
    %c0_6 = arith.constant 0 : index
    %c0_7 = arith.constant 0 : index
    %9 = vector.load %arg4[%c0_6, %c0_7] : memref<1x32xf32, #tpu.memory_space<vmem>>, vector<1x32xf32>
    %10 = arith.addf %8, %9 : vector<1x32xf32>
    %11 = math.tanh %10 : vector<1x32xf32>
    %c0_8 = arith.constant 0 : index
    %c0_9 = arith.constant 0 : index
    %12 = vector.load %arg5[%c0_8, %c0_9] : memref<32x448xf32, #tpu.memory_space<vmem>>, vector<32x448xf32>
    %cst_10 = arith.constant dense<0.000000e+00> : vector<1x448xf32>
    %13 = tpu.matmul %11, %12, %cst_10 {dimension_numbers = #tpu.dot_dimension_numbers<[1], [0], [0], [1], [0, 0, 1, 1], [], []>} : vector<1x32xf32>, vector<32x448xf32>, vector<1x448xf32> -> vector<1x448xf32>
    %c0_11 = arith.constant 0 : index
    %c0_12 = arith.constant 0 : index
    %14 = vector.load %arg6[%c0_11, %c0_12] : memref<1x448xf32, #tpu.memory_space<vmem>>, vector<1x448xf32>
    %15 = arith.addf %13, %14 : vector<1x448xf32>
    %cst_13 = arith.constant 0.000000e+00 : f32
    %16 = vector.broadcast %cst_13 : f32 to vector<1x384xf32>
    %c0_14 = arith.constant 0 : index
    %c0_15 = arith.constant 0 : index
    %17 = vector.load %arg7[%c0_14, %c0_15] : memref<1x384xf32, #tpu.memory_space<vmem>>, vector<1x384xf32>
    tpu.vector_store %arg7[%c0_14, %c0_15], %16 {strides = array<i32>} : memref<1x384xf32, #tpu.memory_space<vmem>>, vector<1x384xf32>,
    %18 = vector.extract_strided_slice %15 {offsets = [0, 0], sizes = [1, 128], strides = [1, 1]} : vector<1x448xf32> to vector<1x128xf32>
    %c0_16 = arith.constant 0 : index
    %c0_17 = arith.constant 0 : index
    %19 = vector.load %arg7[%c0_16, %c0_17] : memref<1x384xf32, #tpu.memory_space<vmem>>, vector<1x128xf32>
    tpu.vector_store %arg7[%c0_16, %c0_17], %18 {strides = array<i32>} : memref<1x384xf32, #tpu.memory_space<vmem>>, vector<1x128xf32>,
    %20 = vector.extract_strided_slice %15 {offsets = [0, 128], sizes = [1, 128], strides = [1, 1]} : vector<1x448xf32> to vector<1x128xf32>
    %21 = vector.extract_strided_slice %15 {offsets = [0, 256], sizes = [1, 128], strides = [1, 1]} : vector<1x448xf32> to vector<1x128xf32>
    %22 = arith.negf %21 : vector<1x128xf32>
    %23 = math.exp %22 : vector<1x128xf32>
    %cst_18 = arith.constant 1.000000e+00 : f32
    %24 = vector.broadcast %cst_18 : f32 to vector<1x128xf32>
    %25 = arith.addf %24, %23 : vector<1x128xf32>
    %26 = arith.divf %24, %25 : vector<1x128xf32>
    %27 = arith.mulf %20, %26 : vector<1x128xf32>
    %c0_19 = arith.constant 0 : index
    %c128 = arith.constant 128 : index
    %28 = vector.load %arg7[%c0_19, %c128] : memref<1x384xf32, #tpu.memory_space<vmem>>, vector<1x128xf32>
    tpu.vector_store %arg7[%c0_19, %c128], %27 {strides = array<i32>} : memref<1x384xf32, #tpu.memory_space<vmem>>, vector<1x128xf32>,
    %29 = vector.extract_strided_slice %15 {offsets = [0, 384], sizes = [1, 64], strides = [1, 1]} : vector<1x448xf32> to vector<1x64xf32>
    %c0_20 = arith.constant 0 : index
    %c256 = arith.constant 256 : index
    %30 = vector.load %arg7[%c0_20, %c256] : memref<1x384xf32, #tpu.memory_space<vmem>>, vector<1x64xf32>
    tpu.vector_store %arg7[%c0_20, %c256], %29 {strides = array<i32>} : memref<1x384xf32, #tpu.memory_space<vmem>>, vector<1x64xf32>,
    return
  }
}

</mosaic_0001>

<bundles_post_ra>
// kernel: tpu_custom_call.1
= control target key start
LH: loop header
LB: loop body
LE: loop exit
PB: predicated region body
PF: predicated region fallthrough
CT: control target
= control target key end

     0   :  { %13 = vsyncpa [#allocation4], 0  ;;  %s609_s0 = inlined_call_operand.<no memory space> [shape: f32[1], index: 0, kind: input, shape index: {}]   ;;  %s610_s1 = inlined_call_operand.vmem [shape: f32[1,32], index: 1, kind: input, shape index: {}]   ;;  %s611_s2 = inlined_call_operand.vmem [shape: f32[1,32], index: 2, kind: input, shape index: {}]   ;;  %s612_s3 = inlined_call_operand.hbm [shape: f32[32,32], index: 3, kind: input, shape index: {}]   ;;  %s613_s4 = inlined_call_operand.vmem [shape: f32[1,32], index: 4, kind: input, shape index: {}]   ;;  %s614_s5 = inlined_call_operand.hbm [shape: f32[32,448], index: 5, kind: input, shape index: {}]   ;;  %s615_s6 = inlined_call_operand.vmem [shape: f32[1,448], index: 6, kind: input, shape index: {}]   ;;  %s616_s7 = inlined_call_operand.hbm [shape: f32[1,384], index: 7, kind: output, shape index: {}]  }
   0x1   :  { %14 = vsyncpa [#allocation7], 0 }
   0x2   :  { %15 = vsyncpa [#allocation5], 0  ;;  %s493_s24 = smov [#allocation3]   ;;  %s421_s28 = scalar_lea.hbm %s612_s3, 512 }
   0x3   :  { %s27_s25 = sshll.u32 %s493_s24, 4  ;;  %p422_p0 = scmp.ne.s32.totalorder %s612_s3, %s421_s28  ;;  %s28_s25 = int_to_ptr.vmem [resolvable:$true] %s27_s25 }
   0x4   :  { %p425_p1 = scmp.lt.u32.totalorder %s421_s28, %s612_s3 }
   0x6   :  { %p427_p2 = pnand %p425_p1, %p422_p0 }
   0x8   :  { %430 = shalt.err (!%p427_p2)
}
   0x9   :  { %s431_s10 = scalar_lea.vmem %s28_s25, 512  ;;  %p436_p4 = scmp.lt.s32.totalorder %s28_s25, %s28_s25 }
   0xa   :  { %p432_p3 = scmp.ne.s32.totalorder %s28_s25, %s431_s10  ;;  %p437_p5 = scmp.lt.s32.totalorder %s431_s10, %s431_s10 }
   0xc   :  { %p438_p6 = por %p437_p5, %p436_p4 }
   0xe   :  { %p439_p7 = pnand %p438_p6, %p432_p3 }
  0x10   :  { %442 = shalt.err (!%p439_p7)
}
  0x11   :  { %s494_s11 = smov 128   ;;  %s495_s12 = smov 8  }
  0x12   :  { %33 = dma.hbm_to_vmem [thread:$0]  %s612_s3, 512, %s28_s25, [#allocation4], %s494_s11, %s494_s11, %s495_s12  }
  0x13   :  { %s496_s15 = smov [#allocation6]   ;;  %s443_s19 = scalar_lea.hbm %s614_s5, 2048 }
  0x14   :  { %s41_s16 = sshll.u32 %s496_s15, 4  ;;  %p444_p8 = scmp.ne.s32.totalorder %s614_s5, %s443_s19  ;;  %s42_s16 = int_to_ptr.vmem [resolvable:$true] %s41_s16 }
  0x15   :  { %p447_p9 = scmp.lt.u32.totalorder %s443_s19, %s614_s5 }
  0x17   :  { %p449_p10 = pnand %p447_p9, %p444_p8 }
  0x19   :  { %452 = shalt.err (!%p449_p10)
}
  0x1a   :  { %s453_s24 = scalar_lea.vmem %s42_s16, 2048  ;;  %p458_p12 = scmp.lt.s32.totalorder %s42_s16, %s42_s16 }
  0x1b   :  { %p454_p11 = scmp.ne.s32.totalorder %s42_s16, %s453_s24  ;;  %p459_p13 = scmp.lt.s32.totalorder %s453_s24, %s453_s24 }
  0x1d   :  { %p460_p0 = por %p459_p13, %p458_p12 }
  0x1f   :  { %p461_p1 = pnand %p460_p0, %p454_p11 }
  0x21   :  { %464 = shalt.err (!%p461_p1)
}
  0x22   :  { %s497_s3 = smov 512   ;;  %s498_s25 = smov 32  }
  0x23   :  { %47 = dma.hbm_to_vmem [thread:$0]  %s614_s5, 2048, %s42_s16, [#allocation7], %s497_s3, %s497_s3, %s498_s25  }
  0x24   :  { %487 = dma.done.wait [#allocation4], 512  }
  0x25   :  { %488 = vsyncadd [#allocation4], 4294966784 }
  0x26   :  { %489 = dma.done.wait [#allocation7], 2048  }
  0x27   :  { %490 = vsyncadd [#allocation7], 4294965248  ;;  %v161_v0 = vlaneseq  ;;  %v499_v1 = vmov 0.0|0.0   ;;  %vm500_vm0 = vmmov 0   ;;  %v501_v2 = vmov 0.0   ;;  %v63_v4 = vld [vmem:[#allocation3] sm:$0xff] }
  0x28   :  { %381 = vmatprep.subr.bf16.mxu0 %v499_v1  ;;  %378 = vmatprep.mubr.msk.f32.mxu0 %vm500_vm0, %v501_v2  ;;  %v58_v3 = vstv %s609_s0  ;;  %v64_v5 = vld [vmem:[#allocation3 + $0x8] sm:$0xff]  ;;  %v65_v6 = vld [vmem:[#allocation3 + $0x10] sm:$0xff]  ;;  %v66_v8 = vld [vmem:[#allocation3 + $0x18] sm:$0xff]  ;;  %vm68_vm2 = vcmask 261120  }
  0x29   :  { %vm328_vm1 = vcmp.lt.s32.totalorder %v161_v0, 384  ;;  %248 = vmatprep.mubr.f32.mxu1 %v501_v2  ;;  %v382_v7 = vpack.c.bf16 %v64_v5, %v63_v4  ;;  %v57_v9 = vld [vmem:[%s610_s1] sm:$0x1]  ;;  %v385_v12 = vpack.c.bf16 %v66_v8, %v65_v6  ;;  %v144_v15 = vld [vmem:[#allocation6 + $0x8] sm:$0xff]  ;;  %v146_v17 = vld [vmem:[#allocation6 + $0x18] sm:$0xff]  ;;  %v162_v44 = vshrl.u32 %v161_v0, 7 }
  0x2a   :  { %330 = vst.msk [vmem:[#allocation8] sm:$0x7] %vm328_vm1, %v501_v2  ;;  %v60_v10 = vld [vmem:[%s611_s2] sm:$0x1]  ;;  %v59_v11 = vmul.f32 %v58_v3, %v57_v9  ;;  %v148_v16 = vld [vmem:[#allocation6 + $0x28] sm:$0xff]  ;;  %v150_v19 = vld [vmem:[#allocation6 + $0x38] sm:$0xff] }
  0x2b   :  { %383 = vmatpush3.bf16.msra.mxu0 %v382_v7  ;;  %v387_v18 = vpack.c.bf16 %v148_v16, %v144_v15  ;;  %v143_v20 = vld [vmem:[#allocation6] sm:$0xff]  ;;  %v395_v22 = vpack.c.bf16 %v150_v19, %v146_v17  ;;  %v145_v24 = vld [vmem:[#allocation6 + $0x10] sm:$0xff]  ;;  %v152_v26 = vld [vmem:[#allocation6 + $0x48] sm:$0xff]  ;;  %v163_v45 = vsub.s32 0, %v162_v44  ;;  %v171_v46 = vsub.s32 2, %v162_v44 }
  0x2c   :  { %384 = vmatprep.subr.bf16.mxu0 %v499_v1  ;;  %v61_v13 = vadd.f32 %v60_v10, %v59_v11  ;;  %v147_v21 = vld [vmem:[#allocation6 + $0x20] sm:$0xff]  ;;  %v149_v25 = vld [vmem:[#allocation6 + $0x30] sm:$0xff]  ;;  %v156_v28 = vld [vmem:[#allocation6 + $0x68] sm:$0xff]  ;;  %v175_v48 = vsub.s32 3, %v162_v44  ;;  %vm588_vm3 = vcmp.lt.s32.totalorder %v161_v0, 128  ;;  %vm342_vm4 = vcmp.lt.s32.totalorder %v161_v0, 64 }
  0x2d   :  { %v389_v23 = vpack.c.bf16 %v147_v21, %v143_v20  ;;  %388 = vmatprep.subr.bf16.mxu1 %v387_v18  ;;  %v397_v27 = vpack.c.bf16 %v149_v25, %v145_v24  ;;  %v154_v29 = vld [vmem:[#allocation6 + $0x58] sm:$0xff]  ;;  %v391_v31 = vpack.c.bf16 %v156_v28, %v152_v26  ;;  %v151_v33 = vld [vmem:[#allocation6 + $0x40] sm:$0xff]  ;;  %v153_v35 = vld [vmem:[#allocation6 + $0x50] sm:$0xff]  ;;  %v167_v63 = vsub.s32 1, %v162_v44 }
  0x2e   :  { %413 = vtanh.f32 %v61_v13  ;;  %v158_v30 = vld [vmem:[#allocation6 + $0x78] sm:$0xff]  ;;  %v155_v34 = vld [vmem:[#allocation6 + $0x60] sm:$0xff]  ;;  %v157_v37 = vld [vmem:[#allocation6 + $0x70] sm:$0xff] }
  0x2f   :  { %386 = vmatpush3.bf16.msra.mxu0 %v385_v12  ;;  %390 = vmatpush1.bf16.msra.mxu1 %v389_v23  ;;  %v399_v32 = vpack.c.bf16 %v158_v30, %v154_v29  ;;  %v393_v36 = vpack.c.bf16 %v155_v34, %v151_v33  ;;  %v401_v38 = vpack.c.bf16 %v157_v37, %v153_v35  ;;  %v67_v39 = vld [vmem:[%s613_s4] sm:$0x1]  ;;  %s502_s4 = smov [#allocation8]  }
  0x30   :  { %396 = vmatprep.subr.bf16.mxu0 %v395_v22  ;;  %392 = vmatprep.subr.bf16.mxu1 %v391_v31  ;;  %v159_v47 = vld [vmem:[%s615_s6] sm:$0xf]  ;;  %s351_s6 = sshll.u32 %s502_s4, 4  ;;  %s352_s6 = int_to_ptr.vmem [resolvable:$true] %s351_s6 }
  0x31   :  { %v164_v49 = vrot.slane %v159_v47, %v163_v45  ;;  %v172_v50 = vrot.slane %v159_v47, %v171_v46  ;;  %v176_v51 = vrot.slane %v159_v47, %v175_v48  ;;  %v168_v1 = vrot.slane %v159_v47, %v167_v63  ;;  %s465_s11 = scalar_lea.vmem %s352_s6, 48  ;;  %s469_s12 = scalar_lea.vmem %s352_s6, 64 }
  0x32   :  { %p466_p2 = scmp.ne.s32.totalorder %s352_s6, %s465_s11  ;;  %p470_p3 = scmp.lt.s32.totalorder %s352_s6, %s352_s6 }
  0x33   :  { %394 = vmatpush1.bf16.msra.mxu1 %v393_v36  ;;  %p471_p4 = scmp.lt.s32.totalorder %s469_s12, %s465_s11 }
  0x35   :  { %p472_p5 = por %p471_p4, %p470_p3 }
  0x37   :  { %p473_p6 = pnand %p472_p5, %p466_p2 }
  0x38   :  { %v414_v14 = vpop.eup %413 }
  0x39   :  { %379 = vmatmul.mubr.msk.f32.vlgmr.msra.gmra.mrb[0].mxu0 %vm68_vm2, %v414_v14 }
  0x3a   :  { %319 = vmatprep.mubr.f32.mxu0 %v501_v2  ;;  %398 = vmatpush1.bf16.msra.mxu0 %v397_v27 }
  0x3b   :  { %400 = vmatprep.subr.bf16.mxu0 %v399_v32 }
  0x3e   :  { %402 = vmatpush1.bf16.msra.mxu0 %v401_v38 }
 0x10c   :  { %v138_v40 = vpop.f32.mrb[0].mxu0 }
 0x10d   :  { %v139_v41 = vadd.f32 %v138_v40, %v67_v39  ;;  %v380_v42 = vpop.f32.mrb[1].mxu0 }
 0x10f   :  { %415 = vtanh.f32 %v139_v41 }
 0x119   :  { %v416_v43 = vpop.eup %415 }
 0x11a   :  { %362 = vmatmul.mubr.msk.f32.vlgmr.msra.gmra.mrb[0].mxu1 %vm68_vm2, %v416_v43  ;;  %363 = vmatmul.mubr.msk.f32.vlgmr.msra.gmra.mrb[2].mxu0 %vm68_vm2, %v416_v43 }
 0x1ed   :  { %v250_v52 = vpop.f32.mrb[0].mxu1  ;;  %v321_v53 = vpop.f32.mrb[2].mxu0 }
 0x1ee   :  { %v251_v55 = vadd.f32 %v250_v52, %v164_v49  ;;  %v322_v56 = vadd.f32 %v321_v53, %v172_v50  ;;  %v252_v57 = vpop.f32.mrb[1].mxu1  ;;  %v323_v58 = vpop.f32.mrb[3].mxu0 }
 0x1ef   :  { %v324_v59 = vadd.f32 %v323_v58, %v176_v51  ;;  %v253_v2 = vadd.f32 %v252_v57, %v168_v1 }
 0x1f0   :  { %v364_v60 = vmul.f32 -1.442695, %v322_v56  ;;  %333 = vst.msk [vmem:[#allocation8] sm:$0x1] %vm588_vm3, %v251_v55 }
 0x1f1   :  { %344 = vst.msk [vmem:[#allocation8 + $0x2] sm:$0x1] %vm342_vm4, %v324_v59 }
 0x1f2   :  { %417 = vpow2.f32 %v364_v60 }
 0x1fc   :  { %v418_v61 = vpop.eup %417 }
 0x1fd   :  { %v337_v62 = vadd.f32 1.0, %v418_v61 }
 0x1ff   :  { %419 = vrcp.f32 %v337_v62 }
 0x209   :  { %v420_v3 = vpop.eup %419 }
 0x20a   :  { %v340_v4 = vmul.f32 %v420_v3, %v253_v2 }
 0x20c   :  { %341 = vst.msk [vmem:[#allocation8 + $0x1] sm:$0x1] %vm588_vm3, %v340_v4 }
 0x20d   :  { %476 = shalt.err (!%p473_p6)
}
 0x20e   :  { %s477_s15 = scalar_lea.hbm %s616_s7, 48 }
 0x20f   :  { %p478_p7 = scmp.ne.s32.totalorder %s616_s7, %s477_s15  ;;  %p481_p8 = scmp.lt.u32.totalorder %s477_s15, %s616_s7 }
 0x211   :  { %p483_p9 = pnand %p481_p8, %p478_p7 }
 0x213   :  { %486 = shalt.err (!%p483_p9)
}
 0x214   :  { %354 = dma.vmem_to_hbm [thread:$0]  %s352_s6, 48, %s616_s7, [#allocation5]  }
 0x215   :  { %491 = dma.done.wait [#allocation5], 48  }
 0x216   :  { %492 = vsyncadd [#allocation5], 4294967248 }
 0x217   :  { %358 = vsyncpa [#allocation4], 1 }
 0x218   :  { %359 = vsyncpa [#allocation7], 1 }
 0x219   :  { %360 = vsyncpa [#allocation5], 1 }

</bundles_post_ra>
